<compile_context>
chip_gen: v7x
topology: tpu7x:2x2x1
jax: 0.10.0
libtpu: 0.0.40
codegen_flags: <defaults>
</compile_context>

<pallas_src>
import functools

import jax
import jax.numpy as jnp
from jax.experimental import pallas as pl
from jax.experimental.pallas import tpu as pltpu


def _round_up(x, m):
    return ((x + m - 1) // m) * m


def attention_kernel(x_ref, wfc_ref, wall_ref, ball_ref, out_ref, acc_ref, *,
                     inv_hw, inv_temp, off_kernel, kernel_num, hw_rem):
    """Grid = (batch_block, hw_tile).  Streams x, pools, runs fused FC epilogue."""
    h = pl.program_id(1)
    last = pl.num_programs(1) - 1

    @pl.when(h == 0)
    def _init():
        acc_ref[...] = jnp.zeros_like(acc_ref)

    @pl.when(h < last)
    def _accum_full():
        # Full interior tiles: plain partial sum, accumulated in f32.
        acc_ref[...] += jnp.sum(x_ref[...].astype(jnp.float32), axis=-1)

    @pl.when(h == last)
    def _accum_last_and_epilogue():
        x = x_ref[...].astype(jnp.float32)            # [TB, C, THW]
        if hw_rem < x.shape[-1]:
            # Ragged last HW tile: lanes >= hw_rem hold undefined data -> zero them.
            lane = jax.lax.broadcasted_iota(jnp.int32, x.shape, 2)
            x = jnp.where(lane < hw_rem, x, 0.0)
        acc_ref[...] += jnp.sum(x, axis=-1)           # [TB, C]

        # AdaptiveAvgPool2d(1): divide the sum by the true H*W.
        pooled = acc_ref[...] * jnp.float32(inv_hw)                        # [TB, C]
        # fc (1x1 conv, no bias) + ReLU.  (BN is constructed but unused in forward.)
        hid = jnp.maximum(
            jnp.dot(pooled, wfc_ref[...], preferred_element_type=jnp.float32), 0.0)
        # One fused lane-dense head matmul: [channel | filter | spatial | kernel | pad]
        z = (jnp.dot(hid, wall_ref[...], preferred_element_type=jnp.float32)
             + ball_ref[...]) * jnp.float32(inv_temp)                      # [TB, Dpad]

        # Sigmoid heads (channel / filter / spatial); exact math, epilogue is cheap.
        sig = 1.0 / (1.0 + jnp.exp(-z))

        # Kernel-attention head: exact softmax over its lane slice only.
        col = jax.lax.broadcasted_iota(jnp.int32, z.shape, 1)
        kmask = (col >= off_kernel) & (col < off_kernel + kernel_num)
        zk = jnp.where(kmask, z, -jnp.inf)
        zmax = jnp.max(zk, axis=-1, keepdims=True)
        e = jnp.where(kmask, jnp.exp(zk - zmax), 0.0)
        smax = e / jnp.sum(e, axis=-1, keepdims=True)

        # Padded lanes (d_tot..d_pad) carry sigmoid(0)=0.5; the wrapper slices them off.
        out_ref[...] = jnp.where(kmask, smax, sig)


def _choose_tiles(B, C, HW, itemsize, x_budget_total):
    """Jointly pick (tb, thw) so the double-buffered x stream fits the budget.
    Shrink tb before letting thw fall below ~512 lanes; prefer >=2 batch blocks
    so the v7x second TensorCore gets work on the parallel axis."""

    def max_thw(tb):
        m = x_budget_total // (2 * tb * C * itemsize)
        if m >= HW:
            return HW
        return (m // 128) * 128

    # Batch-block candidates: multiples of 8 dividing B (sublane friendly), else B.
    cands = [d for d in range(8, B + 1, 8) if B % d == 0]
    if B <= 8 or not cands:
        cands = [B]

    thw_min = min(HW, 512)
    fitting = [tb for tb in cands if max_thw(tb) >= thw_min]
    if fitting:
        multi = [tb for tb in fitting if B // tb >= 2]   # keep both TCs busy on v7x
        tb = max(multi) if multi else max(fitting)
    else:
        tb = min(cands)                                   # smallest tb; thw floors at 128

    thw = max(128, max_thw(tb))
    if thw > HW:
        thw = HW
    return tb, thw


def attention_forward(x, params, *, kernel_size=3, kernel_num=4, temperature=1.0,
                      _force_thw=None):
    """x: [B, C_in, H, W] (NCHW). Returns the 4 attention tensors."""
    B, C, H, W = x.shape
    HW = H * W
    # Stream x in its HBM dtype (bf16 input halves the read traffic); the kernel
    # upcasts per-tile and accumulates the pooled sum in f32.
    x3 = x.reshape(B, C, HW)

    wfc, wch, bch, wfl, bfl, wsp, bsp, wk, bk = params
    in_planes = wch.shape[0]
    out_planes = wfl.shape[0]
    kk = wsp.shape[0]

    # ---- wrapper-side one-time weight prep: transpose + fuse + lane pad ----
    wfc_t = wfc.T.astype(jnp.float32)                                 # [C, A]
    w_all = jnp.concatenate([wch, wfl, wsp, wk], axis=0).T            # [A, Dtot]
    b_all = jnp.concatenate([bch, bfl, bsp, bk], axis=0)              # [Dtot]
    d_tot = in_planes + out_planes + kk + kernel_num
    d_pad = _round_up(d_tot, 128)
    w_all = jnp.pad(w_all.astype(jnp.float32), ((0, 0), (0, d_pad - d_tot)))
    b_all = jnp.pad(b_all.astype(jnp.float32), (0, d_pad - d_tot)).reshape(1, d_pad)

    # ---- generation-aware VMEM budget (64 MiB on v7x, 128 MiB on v5e/v6e) ----
    try:
        vmem_cap = int(pltpu.get_tpu_info().vmem_capacity_bytes)
    except Exception:
        vmem_cap = 64 * 1024 * 1024
    x_budget_total = min(48 << 20, vmem_cap // 3)     # for the double-buffered x stream

    itemsize = x3.dtype.itemsize
    tb, thw = _choose_tiles(B, C, HW, itemsize, x_budget_total)
    if _force_thw is not None:                        # test hook: exercise ragged tiles
        thw = min(_force_thw, HW)
    nb = B // tb
    nhw = pl.cdiv(HW, thw)
    hw_rem = HW - (nhw - 1) * thw                     # valid lanes in the last HW tile

    off_kernel = in_planes + out_planes + kk
    kern = functools.partial(
        attention_kernel,
        inv_hw=1.0 / float(HW),
        inv_temp=1.0 / float(temperature),
        off_kernel=off_kernel,
        kernel_num=kernel_num,
        hw_rem=hw_rem,
    )

    weight_bytes = 4 * (wfc_t.size + w_all.size + b_all.size)
    est = (2 * tb * C * thw * itemsize        # x double buffer
           + 2 * weight_bytes                 # (double-buffered) constant weights
           + 2 * 4 * tb * d_pad               # output double buffer
           + 4 * tb * C)                      # f32 accumulator scratch
    vmem_limit = int(min(vmem_cap - (8 << 20), max(32 << 20, int(est * 1.4))))

    A = wfc_t.shape[1]
    cost = pl.CostEstimate(
        flops=2 * B * (C * A + A * d_pad),
        transcendentals=B * d_pad,
        bytes_accessed=B * C * HW * itemsize + B * d_pad * 4 + weight_bytes,
    )

    grid_spec = pltpu.PrefetchScalarGridSpec(
        num_scalar_prefetch=0,
        grid=(nb, nhw),
        in_specs=[
            pl.BlockSpec((tb, C, thw), lambda b, h: (b, 0, h)),
            pl.BlockSpec(wfc_t.shape, lambda b, h: (0, 0)),
            pl.BlockSpec(w_all.shape, lambda b, h: (0, 0)),
            pl.BlockSpec(b_all.shape, lambda b, h: (0, 0)),
        ],
        out_specs=pl.BlockSpec((tb, d_pad), lambda b, h: (b, 0)),
        scratch_shapes=[pltpu.VMEM((tb, C), jnp.float32)],
    )

    fused = pl.pallas_call(
        kern,
        out_shape=jax.ShapeDtypeStruct((B, d_pad), jnp.float32),
        grid_spec=grid_spec,
        compiler_params=pltpu.CompilerParams(
            dimension_semantics=("parallel", "arbitrary"),
            vmem_limit_bytes=vmem_limit,
        ),
        cost_estimate=cost,
    )(x3, wfc_t, w_all, b_all)

    # split the fused lane-dense output back into the four attention tensors
    o = 0
    channel_attention = fused[:, o:o + in_planes].reshape(B, in_planes, 1, 1)
    o += in_planes
    filter_attention = fused[:, o:o + out_planes].reshape(B, out_planes, 1, 1)
    o += out_planes
    spatial_attention = fused[:, o:o + kk].reshape(B, 1, 1, 1, kernel_size, kernel_size)
    o += kk
    kernel_attention = fused[:, o:o + kernel_num].reshape(B, kernel_num, 1, 1, 1, 1)
    return channel_attention, filter_attention, spatial_attention, kernel_attention


def init_params(key, in_planes, out_planes, kernel_size, kernel_num,
                reduction=0.0625, min_channel=16):
    """Deterministic kaiming-normal (fan_out, relu) init; conv biases = 0
    (matches Attention._initialize_weights). 1x1 conv weights stored [out, in]."""
    attention_channel = max(int(in_planes * reduction), min_channel)

    def kaiming(k, out_ch, in_ch):
        std = (2.0 / out_ch) ** 0.5
        return std * jax.random.normal(k, (out_ch, in_ch), dtype=jnp.float32)

    k0, k1, k2, k3, k4 = jax.random.split(key, 5)
    wfc = kaiming(k0, attention_channel, in_planes)
    wch = kaiming(k1, in_planes, attention_channel)
    bch = jnp.zeros((in_planes,), jnp.float32)
    wfl = kaiming(k2, out_planes, attention_channel)
    bfl = jnp.zeros((out_planes,), jnp.float32)
    wsp = kaiming(k3, kernel_size * kernel_size, attention_channel)
    bsp = jnp.zeros((kernel_size * kernel_size,), jnp.float32)
    wk = kaiming(k4, kernel_num, attention_channel)
    bk = jnp.zeros((kernel_num,), jnp.float32)
    return (wfc, wch, bch, wfl, bfl, wsp, bsp, wk, bk)


def attention_reference(x, params, *, kernel_size, kernel_num, temperature):
    """Pure-JAX reference mirroring the PyTorch forward."""
    wfc, wch, bch, wfl, bfl, wsp, bsp, wk, bk = params
    B = x.shape[0]
    pooled = jnp.mean(x.astype(jnp.float32), axis=(2, 3))
    h = jnp.maximum(pooled @ wfc.T, 0.0)
    ch = jax.nn.sigmoid((h @ wch.T + bch) / temperature).reshape(B, -1, 1, 1)
    fl = jax.nn.sigmoid((h @ wfl.T + bfl) / temperature).reshape(B, -1, 1, 1)
    sp = jax.nn.sigmoid((h @ wsp.T + bsp) / temperature).reshape(
        B, 1, 1, 1, kernel_size, kernel_size)
    kn = jax.nn.softmax((h @ wk.T + bk) / temperature, axis=-1).reshape(
        B, -1, 1, 1, 1, 1)
    return ch, fl, sp, kn


def _check(B, in_planes, out_planes, H, W, kernel_size, kernel_num, seed,
           force_thw=None):
    key = jax.random.PRNGKey(seed)
    kx, kp = jax.random.split(key)
    x = jax.random.normal(kx, (B, in_planes, H, W), dtype=jnp.float32)
    params = init_params(kp, in_planes, out_planes, kernel_size, kernel_num)

    outs = attention_forward(x, params, kernel_size=kernel_size,
                             kernel_num=kernel_num, temperature=1.0,
                             _force_thw=force_thw)
    outs = jax.block_until_ready(outs)
    refs = attention_reference(x, params, kernel_size=kernel_size,
                               kernel_num=kernel_num, temperature=1.0)

    assert outs[0].shape == (B, in_planes, 1, 1)
    assert outs[1].shape == (B, out_planes, 1, 1)
    assert outs[2].shape == (B, 1, 1, 1, kernel_size, kernel_size)
    assert outs[3].shape == (B, kernel_num, 1, 1, 1, 1)
    for o, r in zip(outs, refs):
        if not jnp.allclose(o, r, atol=2e-3, rtol=2e-3):
            raise AssertionError("pallas output mismatch vs reference")


if __name__ == "__main__":
    # Primary small case (matches the requested demo shapes).
    _check(B=2, in_planes=4, out_planes=8, H=16, W=16,
           kernel_size=3, kernel_num=4, seed=0)
    # Non-multiple-of-128 HW with a forced small hw tile to exercise the
    # multi-tile streaming + ragged-last-tile masking path.
    _check(B=2, in_planes=8, out_planes=16, H=20, W=20,
           kernel_size=3, kernel_num=4, seed=0, force_thw=128)
    print("KERNEL_OK")
</pallas_src>

<mosaic_0001>
module attributes {stable_mosaic.version = 11 : i64} {
  func.func @attention_kernel(%arg0: i32, %arg1: i32, %arg2: memref<2x4x256xf32, #tpu.memory_space<vmem>>, %arg3: memref<4x16xf32, #tpu.memory_space<vmem>>, %arg4: memref<16x128xf32, #tpu.memory_space<vmem>>, %arg5: memref<1x128xf32, #tpu.memory_space<vmem>>, %arg6: memref<2x128xf32, #tpu.memory_space<vmem>>, %arg7: memref<2x4xf32, #tpu.memory_space<vmem>>) attributes {dimension_semantics = [#tpu.dimension_semantics<parallel>, #tpu.dimension_semantics<arbitrary>], iteration_bounds = array<i64: 1, 1>, scalar_prefetch = 0 : i64, scratch_operands = 1 : i64, tpu.core_type = #tpu.core_type<tc>, window_params = [{transform_indices = @transform_0, window_bounds = array<i64: 2, 4, 256>}, {pipeline_mode = #tpu.pipeline_mode<synchronous>, transform_indices = @transform_1, window_bounds = array<i64: 4, 16>}, {pipeline_mode = #tpu.pipeline_mode<synchronous>, transform_indices = @transform_2, window_bounds = array<i64: 16, 128>}, {pipeline_mode = #tpu.pipeline_mode<synchronous>, transform_indices = @transform_3, window_bounds = array<i64: 1, 128>}, {transform_indices = @transform_4, window_bounds = array<i64: 2, 128>}]} {
    %c0_i32 = arith.constant 0 : i32
    %0 = arith.cmpi eq, %arg1, %c0_i32 : i32
    %1 = arith.extui %0 : i1 to i32
    %c0_i32_0 = arith.constant 0 : i32
    %2 = arith.cmpi ne, %1, %c0_i32_0 : i32
    scf.if %2 {
      %cst = arith.constant 0.000000e+00 : f32
      %9 = vector.broadcast %cst : f32 to vector<2x4xf32>
      %c0 = arith.constant 0 : index
      %c0_5 = arith.constant 0 : index
      %10 = vector.load %arg7[%c0, %c0_5] : memref<2x4xf32, #tpu.memory_space<vmem>>, vector<2x4xf32>
      tpu.vector_store %arg7[%c0, %c0_5], %9 {strides = array<i32>} : memref<2x4xf32, #tpu.memory_space<vmem>>, vector<2x4xf32>,
    } else {
    }
    %c0_i32_1 = arith.constant 0 : i32
    %3 = arith.cmpi slt, %arg1, %c0_i32_1 : i32
    %4 = arith.extui %3 : i1 to i32
    %c0_i32_2 = arith.constant 0 : i32
    %5 = arith.cmpi ne, %4, %c0_i32_2 : i32
    scf.if %5 {
      %c0 = arith.constant 0 : index
      %c0_5 = arith.constant 0 : index
      %9 = vector.load %arg7[%c0, %c0_5] : memref<2x4xf32, #tpu.memory_space<vmem>>, vector<2x4xf32>
      %c0_6 = arith.constant 0 : index
      %c0_7 = arith.constant 0 : index
      %c0_8 = arith.constant 0 : index
      %10 = vector.load %arg2[%c0_6, %c0_7, %c0_8] : memref<2x4x256xf32, #tpu.memory_space<vmem>>, vector<2x4x256xf32>
      %cst = arith.constant dense<0.000000e+00> : vector<2x4xf32>
      %11 = vector.multi_reduction <add>, %10, %cst [2] : vector<2x4x256xf32> to vector<2x4xf32>
      %12 = arith.addf %9, %11 : vector<2x4xf32>
      %c0_9 = arith.constant 0 : index
      %c0_10 = arith.constant 0 : index
      %13 = vector.load %arg7[%c0_9, %c0_10] : memref<2x4xf32, #tpu.memory_space<vmem>>, vector<2x4xf32>
      tpu.vector_store %arg7[%c0_9, %c0_10], %12 {strides = array<i32>} : memref<2x4xf32, #tpu.memory_space<vmem>>, vector<2x4xf32>,
    } else {
    }
    %c0_i32_3 = arith.constant 0 : i32
    %6 = arith.cmpi eq, %arg1, %c0_i32_3 : i32
    %7 = arith.extui %6 : i1 to i32
    %c0_i32_4 = arith.constant 0 : i32
    %8 = arith.cmpi ne, %7, %c0_i32_4 : i32
    scf.if %8 {
      %c0 = arith.constant 0 : index
      %c0_5 = arith.constant 0 : index
      %c0_6 = arith.constant 0 : index
      %9 = vector.load %arg2[%c0, %c0_5, %c0_6] : memref<2x4x256xf32, #tpu.memory_space<vmem>>, vector<2x4x256xf32>
      %c0_7 = arith.constant 0 : index
      %c0_8 = arith.constant 0 : index
      %10 = vector.load %arg7[%c0_7, %c0_8] : memref<2x4xf32, #tpu.memory_space<vmem>>, vector<2x4xf32>
      %cst = arith.constant dense<0.000000e+00> : vector<2x4xf32>
      %11 = vector.multi_reduction <add>, %9, %cst [2] : vector<2x4x256xf32> to vector<2x4xf32>
      %12 = arith.addf %10, %11 : vector<2x4xf32>
      %c0_9 = arith.constant 0 : index
      %c0_10 = arith.constant 0 : index
      %13 = vector.load %arg7[%c0_9, %c0_10] : memref<2x4xf32, #tpu.memory_space<vmem>>, vector<2x4xf32>
      tpu.vector_store %arg7[%c0_9, %c0_10], %12 {strides = array<i32>} : memref<2x4xf32, #tpu.memory_space<vmem>>, vector<2x4xf32>,
      %c0_11 = arith.constant 0 : index
      %c0_12 = arith.constant 0 : index
      %14 = vector.load %arg7[%c0_11, %c0_12] : memref<2x4xf32, #tpu.memory_space<vmem>>, vector<2x4xf32>
      %cst_13 = arith.constant 3.906250e-03 : f32
      %15 = vector.broadcast %cst_13 : f32 to vector<2x4xf32>
      %16 = arith.mulf %14, %15 : vector<2x4xf32>
      %c0_14 = arith.constant 0 : index
      %c0_15 = arith.constant 0 : index
      %17 = vector.load %arg3[%c0_14, %c0_15] : memref<4x16xf32, #tpu.memory_space<vmem>>, vector<4x16xf32>
      %cst_16 = arith.constant dense<0.000000e+00> : vector<2x16xf32>
      %18 = tpu.matmul %16, %17, %cst_16 {dimension_numbers = #tpu.dot_dimension_numbers<[1], [0], [0], [1], [0, 0, 1, 1], [], []>} : vector<2x4xf32>, vector<4x16xf32>, vector<2x16xf32> -> vector<2x16xf32>
      %cst_17 = arith.constant 0.000000e+00 : f32
      %19 = vector.broadcast %cst_17 : f32 to vector<2x16xf32>
      %20 = arith.maximumf %18, %19 : vector<2x16xf32>
      %c0_18 = arith.constant 0 : index
      %c0_19 = arith.constant 0 : index
      %21 = vector.load %arg4[%c0_18, %c0_19] : memref<16x128xf32, #tpu.memory_space<vmem>>, vector<16x128xf32>
      %cst_20 = arith.constant dense<0.000000e+00> : vector<2x128xf32>
      %22 = tpu.matmul %20, %21, %cst_20 {dimension_numbers = #tpu.dot_dimension_numbers<[1], [0], [0], [1], [0, 0, 1, 1], [], []>} : vector<2x16xf32>, vector<16x128xf32>, vector<2x128xf32> -> vector<2x128xf32>
      %c0_21 = arith.constant 0 : index
      %c0_22 = arith.constant 0 : index
      %23 = vector.load %arg5[%c0_21, %c0_22] : memref<1x128xf32, #tpu.memory_space<vmem>>, vector<1x128xf32>
      %24 = vector.broadcast %23 : vector<1x128xf32> to vector<2x128xf32>
      %25 = arith.addf %22, %24 : vector<2x128xf32>
      %cst_23 = arith.constant 1.000000e+00 : f32
      %26 = vector.broadcast %cst_23 : f32 to vector<2x128xf32>
      %27 = arith.mulf %25, %26 : vector<2x128xf32>
      %cst_24 = arith.constant 0.000000e+00 : f32
      %28 = vector.broadcast %cst_24 : f32 to vector<2x128xf32>
      %29 = arith.subf %28, %27 : vector<2x128xf32>
      %30 = math.exp %29 : vector<2x128xf32>
      %cst_25 = arith.constant 1.000000e+00 : f32
      %31 = vector.broadcast %cst_25 : f32 to vector<2x128xf32>
      %32 = arith.addf %31, %30 : vector<2x128xf32>
      %cst_26 = arith.constant 1.000000e+00 : f32
      %33 = vector.broadcast %cst_26 : f32 to vector<2x128xf32>
      %34 = arith.divf %33, %32 : vector<2x128xf32>
      %35 = tpu.iota {dimensions = array<i32: 1>} : vector<2x128xi32>
      %c21_i32 = arith.constant 21 : i32
      %36 = vector.broadcast %c21_i32 : i32 to vector<2x128xi32>
      %37 = arith.cmpi sge, %35, %36 : vector<2x128xi32>
      %c25_i32 = arith.constant 25 : i32
      %38 = vector.broadcast %c25_i32 : i32 to vector<2x128xi32>
      %39 = arith.cmpi slt, %35, %38 : vector<2x128xi32>
      %40 = arith.andi %37, %39 : vector<2x128xi1>
      %cst_27 = arith.constant 0xFF800000 : f32
      %41 = vector.broadcast %cst_27 : f32 to vector<2x128xf32>
      %42 = arith.select %40, %27, %41 : vector<2x128xi1>, vector<2x128xf32>
      %cst_28 = arith.constant dense<0xFF800000> : vector<2xf32>
      %43 = vector.multi_reduction <maximumf>, %42, %cst_28 [1] : vector<2x128xf32> to vector<2xf32>
      %44 = vector.shape_cast %43 : vector<2xf32> to vector<2x1xf32>
      %45 = vector.broadcast %44 : vector<2x1xf32> to vector<2x128xf32>
      %46 = arith.subf %42, %45 : vector<2x128xf32>
      %47 = math.exp %46 : vector<2x128xf32>
      %cst_29 = arith.constant 0.000000e+00 : f32
      %48 = vector.broadcast %cst_29 : f32 to vector<2x128xf32>
      %49 = arith.select %40, %47, %48 : vector<2x128xi1>, vector<2x128xf32>
      %cst_30 = arith.constant dense<0.000000e+00> : vector<2xf32>
      %50 = vector.multi_reduction <add>, %49, %cst_30 [1] : vector<2x128xf32> to vector<2xf32>
      %51 = vector.shape_cast %50 : vector<2xf32> to vector<2x1xf32>
      %52 = vector.broadcast %51 : vector<2x1xf32> to vector<2x128xf32>
      %53 = arith.divf %49, %52 : vector<2x128xf32>
      %54 = arith.select %40, %53, %34 : vector<2x128xi1>, vector<2x128xf32>
      %c0_31 = arith.constant 0 : index
      %c0_32 = arith.constant 0 : index
      %55 = vector.load %arg6[%c0_31, %c0_32] : memref<2x128xf32, #tpu.memory_space<vmem>>, vector<2x128xf32>
      tpu.vector_store %arg6[%c0_31, %c0_32], %54 {strides = array<i32>} : memref<2x128xf32, #tpu.memory_space<vmem>>, vector<2x128xf32>,
    } else {
    }
    return
  }
  func.func @transform_0(%arg0: i32, %arg1: i32) -> (i32, i32, i32) {
    %c0_i32 = arith.constant 0 : i32
    %c0_i32_0 = arith.constant 0 : i32
    return %arg0, %c0_i32, %arg1 : i32, i32, i32
  }
  func.func @transform_1(%arg0: i32, %arg1: i32) -> (i32, i32) {
    %c0_i32 = arith.constant 0 : i32
    %c0_i32_0 = arith.constant 0 : i32
    %c0_i32_1 = arith.constant 0 : i32
    return %c0_i32, %c0_i32_0 : i32, i32
  }
  func.func @transform_2(%arg0: i32, %arg1: i32) -> (i32, i32) {
    %c0_i32 = arith.constant 0 : i32
    %c0_i32_0 = arith.constant 0 : i32
    %c0_i32_1 = arith.constant 0 : i32
    return %c0_i32, %c0_i32_0 : i32, i32
  }
  func.func @transform_3(%arg0: i32, %arg1: i32) -> (i32, i32) {
    %c0_i32 = arith.constant 0 : i32
    %c0_i32_0 = arith.constant 0 : i32
    %c0_i32_1 = arith.constant 0 : i32
    return %c0_i32, %c0_i32_0 : i32, i32
  }
  func.func @transform_4(%arg0: i32, %arg1: i32) -> (i32, i32) {
    %c0_i32 = arith.constant 0 : i32
    %c0_i32_0 = arith.constant 0 : i32
    return %arg0, %c0_i32 : i32, i32
  }
}

</mosaic_0001>

<bundles_post_ra>
// kernel: tpu_custom_call.1
= control target key start
LH: loop header
LB: loop body
LE: loop exit
PB: predicated region body
PF: predicated region fallthrough
CT: control target
= control target key end

     0   :  { %9 = vsyncpa [#allocation4], 0  ;;  %s597_s0 = inlined_call_operand.hbm [shape: f32[2,4,256], index: 0, kind: input, shape index: {}]   ;;  %s598_s1 = inlined_call_operand.hbm [shape: f32[4,16], index: 1, kind: input, shape index: {}]   ;;  %s599_s2 = inlined_call_operand.hbm [shape: f32[16,128], index: 2, kind: input, shape index: {}]   ;;  %s600_s3 = inlined_call_operand.vmem [shape: f32[1,128], index: 3, kind: input, shape index: {}]   ;;  %s601_s4 = inlined_call_operand.hbm [shape: f32[2,128], index: 4, kind: output, shape index: {}]  }
   0x1   :  { %10 = vsyncpa [#allocation7], 0 }
   0x2   :  { %11 = vsyncpa [#allocation5], 0  ;;  %s488_s15 = smov [#allocation6]   ;;  %s489_s17 = smov [#allocation3]  }
   0x3   :  { %s30_s16 = sshll.u32 %s488_s15, 4  ;;  %s17_s18 = sshll.u32 %s489_s17, 4  ;;  %s31_s16 = int_to_ptr.vmem [resolvable:$true] %s30_s16  ;;  %s522_s18 = int_to_ptr.vmem [resolvable:$true] %s17_s18 }
   0x4   :  { %s394_s21 = scalar_lea.hbm %s598_s1, 64 }
   0x5   :  { %p395_p0 = scmp.ne.s32.totalorder %s598_s1, %s394_s21  ;;  %p398_p1 = scmp.lt.u32.totalorder %s394_s21, %s598_s1 }
   0x7   :  { %p400_p2 = pnand %p398_p1, %p395_p0 }
   0x9   :  { %403 = shalt.err (!%p400_p2)
}
   0xa   :  { %s404_s26 = scalar_lea.vmem %s31_s16, 64  ;;  %p409_p4 = scmp.lt.s32.totalorder %s31_s16, %s31_s16 }
   0xb   :  { %p405_p3 = scmp.ne.s32.totalorder %s31_s16, %s404_s26  ;;  %p410_p5 = scmp.lt.s32.totalorder %s404_s26, %s404_s26 }
   0xd   :  { %p411_p6 = por %p410_p5, %p409_p4 }
   0xf   :  { %p412_p7 = pnand %p411_p6, %p405_p3 }
  0x11   :  { %415 = shalt.err (!%p412_p7)
}
  0x12   :  { %33 = dma.hbm_to_vmem [thread:$0]  %s598_s1, 64, %s31_s16, [#allocation7]  }
  0x13   :  { %s416_s5 = scalar_lea.hbm %s597_s0, 256 }
  0x14   :  { %p417_p8 = scmp.ne.s32.totalorder %s597_s0, %s416_s5  ;;  %p420_p9 = scmp.lt.u32.totalorder %s416_s5, %s597_s0 }
  0x16   :  { %p422_p10 = pnand %p420_p9, %p417_p8 }
  0x18   :  { %425 = shalt.err (!%p422_p10)
}
  0x19   :  { %s426_s10 = scalar_lea.vmem %s522_s18, 256  ;;  %p431_p12 = scmp.lt.s32.totalorder %s522_s18, %s522_s18 }
  0x1a   :  { %p427_p11 = scmp.ne.s32.totalorder %s522_s18, %s426_s10  ;;  %p432_p13 = scmp.lt.s32.totalorder %s426_s10, %s426_s10 }
  0x1c   :  { %p433_p0 = por %p432_p13, %p431_p12 }
  0x1e   :  { %p434_p1 = pnand %p433_p0, %p427_p11 }
  0x20   :  { %437 = shalt.err (!%p434_p1)
}
  0x21   :  { %s490_s1 = smov 128   ;;  %s491_s11 = smov 8  }
  0x22   :  { %23 = dma.hbm_to_vmem [thread:$0]  %s597_s0, 256, %s522_s18, [#allocation4], %s490_s1, %s490_s1, %s491_s11  }
  0x23   :  { %s492_s14 = smov [#allocation8]   ;;  %s438_s19 = scalar_lea.hbm %s599_s2, 256 }
  0x24   :  { %s39_s15 = sshll.u32 %s492_s14, 4  ;;  %p439_p2 = scmp.ne.s32.totalorder %s599_s2, %s438_s19  ;;  %s40_s15 = int_to_ptr.vmem [resolvable:$true] %s39_s15 }
  0x25   :  { %p442_p3 = scmp.lt.u32.totalorder %s438_s19, %s599_s2 }
  0x27   :  { %p444_p4 = pnand %p442_p3, %p439_p2 }
  0x29   :  { %447 = shalt.err (!%p444_p4)
}
  0x2a   :  { %s448_s24 = scalar_lea.vmem %s40_s15, 256  ;;  %p453_p6 = scmp.lt.s32.totalorder %s40_s15, %s40_s15 }
  0x2b   :  { %p449_p5 = scmp.ne.s32.totalorder %s40_s15, %s448_s24  ;;  %p454_p7 = scmp.lt.s32.totalorder %s448_s24, %s448_s24 }
  0x2d   :  { %p455_p8 = por %p454_p7, %p453_p6 }
  0x2f   :  { %p456_p9 = pnand %p455_p8, %p449_p5 }
  0x31   :  { %459 = shalt.err (!%p456_p9)
}
  0x32   :  { %45 = dma.hbm_to_vmem [thread:$0]  %s599_s2, 256, %s40_s15, [#allocation7], %s490_s1, %s490_s1, %s491_s11  }
  0x33   :  { %482 = dma.done.wait [#allocation4], 256  }
  0x34   :  { %483 = vsyncadd [#allocation4], 4294967040 }
  0x35   :  { %484 = dma.done.wait [#allocation7], 320  }
  0x36   :  { %485 = vsyncadd [#allocation7], 4294966976  ;;  %vm117_vm0 = vcmask 1043456   ;;  %v108_v0 = vld [vmem:[#allocation3] sm:$0xff]  ;;  %v109_v1 = vld [vmem:[#allocation3 + $0x8] sm:$0xff]  ;;  %vm61_vm1 = vcmask 25600   ;;  %v130_v13 = vlaneseq }
  0x37   :  { %v113_v2 = vcombine.high %v108_v0, %v108_v0  ;;  %v118_v3 = vsel %vm117_vm0, %v108_v0, 0.0  ;;  %v114_v4 = vcombine.high %v109_v1, %v109_v1  ;;  %v123_v6 = vsel %vm117_vm0, %v109_v1, 0.0  ;;  %v148_v11 = vld [vmem:[#allocation6] sm:$0xf]  ;;  %v227_v26 = vld [vmem:[#allocation8] sm:$0xff]  ;;  %v228_v27 = vld [vmem:[#allocation8 + $0x8] sm:$0xff] }
  0x38   :  { %v493_v10 = vmov 0.0   ;;  %vm494_vm2 = vmmov 0   ;;  %v495_v12 = vmov 0.0|0.0   ;;  %v131_v14 = vand.u32 127, %v130_v13  ;;  %v353_v32 = vld [vmem:[%s600_s3] ss:$0 sm:$0xff] }
  0x39   :  { %v119_v5 = vsel %vm117_vm0, %v113_v2, 0.0  ;;  %v124_v7 = vsel %vm117_vm0, %v114_v4, 0.0  ;;  %62 = vst.msk [vmem:[#allocation2] sm:$0x3] %vm61_vm1, %v493_v10  ;;  %360 = vmatprep.subr.mxu0 %v493_v10  ;;  %362 = vmatprep.mubr.msk.f32.mxu0 %vm494_vm2, %v493_v10  ;;  %v133_v15 = vshrl.u32 %v130_v13, 7  ;;  %vm140_vm3 = vcmask 1041409  }
  0x3a   :  { %v120_v8 = vadd.f32 %v119_v5, %v118_v3  ;;  %v125_v9 = vadd.f32 %v124_v7, %v123_v6  ;;  %361 = vmatpush3.msk.msra.mxu0 %vm117_vm0, %v148_v11  ;;  %369 = vmatprep.mubr.msk.f32.mxu1 %vm494_vm2, %v493_v10  ;;  %vm149_vm4 = vcmask 31744   ;;  %v373_v28 = vpack.c.bf16 %v228_v27, %v227_v26  ;;  %s496_s3 = smov [#allocation9]  }
  0x3b   :  { %372 = vmatprep.subr.bf16.mxu1 %v495_v12  ;;  %v134_v17 = vsub.s32 %v131_v14, %v133_v15  ;;  %vm236_vm5 = vcmask 130048   ;;  %vm316_vm6 = vcmp.ge.s32.totalorder %v131_v14, 21  ;;  %vm317_vm7 = vcmp.lt.s32.totalorder %v131_v14, 25  ;;  %s341_s26 = sshll.u32 %s496_s3, 4  ;;  %s342_s26 = int_to_ptr.vmem [resolvable:$true] %s341_s26 }
  0x3c   :  { %121 = vadd.xlane.f32.xlu0 %v120_v8  ;;  %374 = vmatpush3.bf16.msra.mxu1 %v373_v28  ;;  %vm575_vm8 = vmand %vm316_vm6, %vm317_vm7  ;;  %vm320_vm9 = vcmask 1041408   ;;  %s460_s27 = scalar_lea.vmem %s342_s26, 32  ;;  %p465_p11 = scmp.lt.s32.totalorder %s342_s26, %s342_s26 }
  0x3d   :  { %p461_p10 = scmp.ne.s32.totalorder %s342_s26, %s460_s27  ;;  %p466_p12 = scmp.lt.s32.totalorder %s460_s27, %s460_s27 }
  0x3f   :  { %p467_p13 = por %p466_p12, %p465_p11 }
  0x40   :  { %126 = vadd.xlane.f32.xlu0 %v125_v9  ;;  %v110_v21 = vld [vmem:[#allocation2] sm:$0x3] }
  0x41   :  { %p468_p0 = pnand %p467_p13, %p461_p10 }
  0xc9   :  { %v122_v16 = vpop.xlane.xlu0 %121 }
  0xca   :  { %v135_v19 = vrot.slane %v122_v16, %v134_v17 }
  0xcd   :  { %v127_v18 = vpop.xlane.xlu0 %126 }
  0xce   :  { %v139_v20 = vrot.slane %v127_v18, %v134_v17 }
  0xd0   :  { %v141_v22 = vsel %vm140_vm3, %v139_v20, %v135_v19 }
  0xd1   :  { %v143_v23 = vadd.f32 %v141_v22, %v110_v21 }
  0xd3   :  { %145 = vst.msk [vmem:[#allocation2] sm:$0x3] %vm61_vm1, %v143_v23 }
  0xda   :  { %v146_v24 = vld [vmem:[#allocation2] sm:$0x3] }
  0xdb   :  { %v147_v25 = vmul.f32 0.00390625, %v146_v24 }
  0xdd   :  { %363 = vmatmul.mubr.msk.f32.vlgmr.msra.gmra.mrb[0].mxu0 %vm149_vm4, %v147_v25 }
 0x1b0   :  { %v222_v29 = vpop.f32.mrb[0].mxu0 }
 0x1b1   :  { %v226_v30 = vmax.f32 %v222_v29, 0.0  ;;  %v364_v31 = vpop.f32.mrb[1].mxu0 }
 0x1b3   :  { %370 = vmatmul.mubr.msk.f32.vlgmr.msra.gmra.mrb[0].mxu1 %vm236_vm5, %v226_v30 }
 0x286   :  { %v306_v33 = vpop.f32.mrb[0].mxu1 }
 0x287   :  { %v307_v35 = vadd.f32 %v353_v32, %v306_v33  ;;  %v371_v36 = vpop.f32.mrb[1].mxu1 }
 0x289   :  { %v319_v37 = vsel %vm575_vm8, %v307_v35, -inf  ;;  %v310_v45 = vsub.f32 0.0, %v307_v35 }
 0x28a   :  { %v321_v38 = vsel %vm320_vm9, %v319_v37, -inf }
 0x28b   :  { %322 = vmax.xlane.f32.xlu1 %v321_v38  ;;  %v311_v46 = vmul.f32 1.442695, %v310_v45 }
 0x318   :  { %v323_v39 = vpop.xlane.xlu1 %322 }
 0x319   :  { %v324_v40 = vsub.f32 %v319_v37, %v323_v39 }
 0x31b   :  { %v325_v41 = vmul.f32 1.442695, %v324_v40 }
 0x31d   :  { %386 = vpow2.f32 %v325_v41 }
 0x31e   :  { %388 = vpow2.f32 %v311_v46 }
 0x327   :  { %v387_v42 = vpop.eup %386 }
 0x328   :  { %v327_v43 = vsel %vm575_vm8, %v387_v42, 0.0  ;;  %v389_v47 = vpop.eup %388 }
 0x329   :  { %v328_v44 = vsel %vm320_vm9, %v327_v43, 0.0  ;;  %v313_v48 = vadd.f32 1.0, %v389_v47 }
 0x32a   :  { %329 = vadd.xlane.f32.xlu1 %v328_v44 }
 0x3b7   :  { %v330_v49 = vpop.xlane.xlu1 %329 }
 0x3b8   :  { %390 = vrcp.f32 %v330_v49 }
 0x3b9   :  { %392 = vrcp.f32 %v313_v48 }
 0x3c2   :  { %v391_v50 = vpop.eup %390 }
 0x3c3   :  { %v332_v51 = vmul.f32 %v391_v50, %v327_v43  ;;  %v393_v52 = vpop.eup %392 }
 0x3c5   :  { %v333_v53 = vsel %vm575_vm8, %v332_v51, %v393_v52 }
 0x3c6   :  { %334 = vst [vmem:[#allocation9] sm:$0x3] %v333_v53 }
 0x3c7   :  { %471 = shalt.err (!%p468_p0)
}
 0x3c8   :  { %s472_s30 = scalar_lea.hbm %s601_s4, 32 }
 0x3c9   :  { %p473_p1 = scmp.ne.s32.totalorder %s601_s4, %s472_s30  ;;  %p476_p2 = scmp.lt.u32.totalorder %s472_s30, %s601_s4 }
 0x3cb   :  { %p478_p3 = pnand %p476_p2, %p473_p1 }
 0x3cd   :  { %481 = shalt.err (!%p478_p3)
}
 0x3ce   :  { %344 = dma.vmem_to_hbm [thread:$0]  %s342_s26, 32, %s601_s4, [#allocation5]  }
 0x3cf   :  { %486 = dma.done.wait [#allocation5], 32  }
 0x3d0   :  { %487 = vsyncadd [#allocation5], 4294967264 }
 0x3d1   :  { %348 = vsyncpa [#allocation4], 1 }
 0x3d2   :  { %349 = vsyncpa [#allocation7], 1 }
 0x3d3   :  { %350 = vsyncpa [#allocation5], 1 }

</bundles_post_ra>
